<compile_context>
chip_gen: v5e
topology: v5e:2x2
jax: 0.10.0
libtpu: 0.0.40
codegen_flags: <defaults>
</compile_context>

<pallas_src>
import functools

import jax
import jax.numpy as jnp
from jax.experimental import pallas as pl
from jax.experimental.pallas import tpu as pltpu


def lstm_predictor_kernel(x_tm_ref, w_ih_ref, w_hh_ref, b_ref,
                          w_out_ref, b_out_ref, out_ref, *, T, B, B_pad, H):
    f32 = jnp.float32
    bf16 = jnp.bfloat16
    G = 4 * H

    # ---- hoisted lane-scale constants (computed once, off the serial path) --
    # sigmoid(x) = 0.5*tanh(0.5*x) + 0.5  (i/f/o columns);  tanh(x) for g cols.
    col = jax.lax.broadcasted_iota(jnp.int32, (1, G), 1)
    is_g = (col >= 2 * H) & (col < 3 * H)
    scale = jnp.where(is_g, 1.0, 0.5).astype(f32)   # pre-scale == post-scale
    bias = jnp.where(is_g, 0.0, 0.5).astype(f32)    # post-bias

    # ---- hoisted input projection: ONE bf16 MXU matmul for all timesteps ----
    # x_tm_ref: [T*B_pad, D] time-major (padded rows are zero); the 0.5
    # sigmoid pre-scale is folded into the projection here, once.
    xw = (jnp.dot(x_tm_ref[...].astype(bf16), w_ih_ref[...].astype(bf16),
                  preferred_element_type=f32)
          + b_ref[...]) * scale                                  # [T*B_pad, 4H]

    # Recurrent weights: pre-scale folded, cast to bf16 once (0.5 is exact).
    w_hh_bf = (w_hh_ref[...] * scale).astype(bf16)               # [H, 4H]

    h = jnp.zeros((B_pad, H), f32)
    c = jnp.zeros((B_pad, H), f32)

    # ---- fully unrolled recurrence (T small & static) -----------------------
    # Per step only the serial chain remains: bf16 h@W_hh (single MXU pass),
    # one full-width tanh on the EUP, and a handful of VPU ops.
    for t in range(T):
        # dot and add kept adjacent (dot first) -> v7x MRB in-place accumulate.
        gates = jnp.dot(h.astype(bf16), w_hh_bf,
                        preferred_element_type=f32) \
            + xw[t * B_pad:(t + 1) * B_pad, :]                   # [B_pad, 4H]

        acts = jnp.tanh(gates) * scale + bias   # one EUP pass; sigmoid/tanh mix
        i_g = acts[:, 0 * H:1 * H]
        f_g = acts[:, 1 * H:2 * H]
        g_g = acts[:, 2 * H:3 * H]
        o_g = acts[:, 3 * H:4 * H]

        c = f_g * c + i_g * g_g
        h = o_g * jnp.tanh(c)

    # ---- final linear projection on the last hidden state (f32, off-path) ---
    out = jnp.dot(h, w_out_ref[...], preferred_element_type=f32) + b_out_ref[...]
    out_ref[...] = out[:B, :].astype(out_ref.dtype)


@jax.jit
def predictor_forward(x, w_ih, w_hh, b, w_out, b_out):
    """x: [B, T, D] (batch_first), returns [B, O]."""
    B, T, D = x.shape
    H = w_hh.shape[0]
    O = w_out.shape[1]
    B_pad = max(8, ((B + 7) // 8) * 8)

    # Layout plumbing only (one tiny fused op under jit): time-major order so
    # each timestep is a static, 8-sublane-aligned row slice, with the batch
    # zero-padded to a full sublane tile so per-step VPU/EUP work is unmasked.
    # TODO(synk): accept time-major, sublane-padded input upstream to remove
    # even this preamble fusion from the dispatch chain.
    x_tm = jnp.pad(jnp.transpose(x, (1, 0, 2)),
                   ((0, 0), (0, B_pad - B), (0, 0))).reshape(T * B_pad, D)

    vmem = pl.BlockSpec(memory_space=pltpu.MemorySpace.VMEM)
    kernel = functools.partial(lstm_predictor_kernel,
                               T=T, B=B, B_pad=B_pad, H=H)

    # Grid-less: ~20 KB resident, fits trivially in VMEM on v5e/v6e/v7x.
    # Deliberately no batch grid / core split: with tiny B each core would
    # still run the full serial T-step chain (only revisit once per-core
    # batch reaches a full sublane tile, B >= 16).
    return pl.pallas_call(
        kernel,
        out_shape=jax.ShapeDtypeStruct((B, O), jnp.float32),
        in_specs=[vmem] * 6,
        out_specs=vmem,
    )(x_tm, w_ih, w_hh, b, w_out, b_out)


def predictor_reference(x, w_ih, w_hh, b, w_out, b_out):
    """Pure-JAX f32 reference matching PyTorch nn.LSTM + nn.Linear semantics."""
    B, T, D = x.shape
    H = w_hh.shape[0]
    h = jnp.zeros((B, H), jnp.float32)
    c = jnp.zeros((B, H), jnp.float32)
    for t in range(T):
        gates = x[:, t, :] @ w_ih + h @ w_hh + b
        i_g = jax.nn.sigmoid(gates[:, 0 * H:1 * H])
        f_g = jax.nn.sigmoid(gates[:, 1 * H:2 * H])
        g_g = jnp.tanh(gates[:, 2 * H:3 * H])
        o_g = jax.nn.sigmoid(gates[:, 3 * H:4 * H])
        c = f_g * c + i_g * g_g
        h = o_g * jnp.tanh(c)
    return h @ w_out + b_out


if __name__ == "__main__":
    # Small shapes consistent with the module: inputDim=4, hiddenDim=32, outputDim=3
    B, T, D, H, O = 2, 8, 4, 32, 3

    key = jax.random.PRNGKey(0)
    ks = jax.random.split(key, 7)
    bound = 1.0 / jnp.sqrt(H)

    x = jax.random.normal(ks[0], (B, T, D), dtype=jnp.float32)
    # LSTM parameters (gate order i, f, g, o), uniform init like PyTorch.
    w_ih = jax.random.uniform(ks[1], (D, 4 * H), jnp.float32, -bound, bound)
    w_hh = jax.random.uniform(ks[2], (H, 4 * H), jnp.float32, -bound, bound)
    b_ih = jax.random.uniform(ks[3], (4 * H,), jnp.float32, -bound, bound)
    b_hh = jax.random.uniform(ks[4], (4 * H,), jnp.float32, -bound, bound)
    b = (b_ih + b_hh).reshape(1, 4 * H)
    # Output linear layer.
    w_out = jax.random.uniform(ks[5], (H, O), jnp.float32, -bound, bound)
    b_out = jax.random.uniform(ks[6], (1, O), jnp.float32, -bound, bound)

    out = predictor_forward(x, w_ih, w_hh, b, w_out, b_out)
    out = jax.block_until_ready(out)

    ref = predictor_reference(x, w_ih, w_hh, b, w_out, b_out)
    assert out.shape == (B, O)
    # Tolerance loosened vs the pure-f32 version because the MXU matmuls use
    # bf16 operands (f32 accumulation); observed error is well inside this.
    assert jnp.allclose(out, ref, atol=3e-2, rtol=3e-2), "mismatch vs reference"

    print("KERNEL_OK")
</pallas_src>

<mosaic_0001>
module attributes {stable_mosaic.version = 11 : i64} {
  func.func @lstm_predictor_kernel(%arg0: memref<64x4xf32, #tpu.memory_space<vmem>>, %arg1: memref<4x128xf32, #tpu.memory_space<vmem>>, %arg2: memref<32x128xf32, #tpu.memory_space<vmem>>, %arg3: memref<1x128xf32, #tpu.memory_space<vmem>>, %arg4: memref<32x3xf32, #tpu.memory_space<vmem>>, %arg5: memref<1x3xf32, #tpu.memory_space<vmem>>, %arg6: memref<2x3xf32, #tpu.memory_space<vmem>>) attributes {dimension_semantics = [], scalar_prefetch = 0 : i64, scratch_operands = 0 : i64, tpu.core_type = #tpu.core_type<tc>} {
    %0 = tpu.iota {dimensions = array<i32: 1>} : vector<1x128xi32>
    %c64_i32 = arith.constant 64 : i32
    %1 = vector.broadcast %c64_i32 : i32 to vector<1x128xi32>
    %2 = arith.cmpi sge, %0, %1 : vector<1x128xi32>
    %c96_i32 = arith.constant 96 : i32
    %3 = vector.broadcast %c96_i32 : i32 to vector<1x128xi32>
    %4 = arith.cmpi slt, %0, %3 : vector<1x128xi32>
    %5 = arith.andi %2, %4 : vector<1x128xi1>
    %cst = arith.constant 1.000000e+00 : f32
    %cst_0 = arith.constant 5.000000e-01 : f32
    %6 = vector.broadcast %cst : f32 to vector<1x128xf32>
    %7 = vector.broadcast %cst_0 : f32 to vector<1x128xf32>
    %8 = arith.select %5, %6, %7 : vector<1x128xi1>, vector<1x128xf32>
    %cst_1 = arith.constant 0.000000e+00 : f32
    %cst_2 = arith.constant 5.000000e-01 : f32
    %9 = vector.broadcast %cst_1 : f32 to vector<1x128xf32>
    %10 = vector.broadcast %cst_2 : f32 to vector<1x128xf32>
    %11 = arith.select %5, %9, %10 : vector<1x128xi1>, vector<1x128xf32>
    %c0 = arith.constant 0 : index
    %c0_3 = arith.constant 0 : index
    %12 = vector.load %arg0[%c0, %c0_3] : memref<64x4xf32, #tpu.memory_space<vmem>>, vector<64x4xf32>
    %13 = arith.truncf %12 : vector<64x4xf32> to vector<64x4xbf16>
    %c0_4 = arith.constant 0 : index
    %c0_5 = arith.constant 0 : index
    %14 = vector.load %arg1[%c0_4, %c0_5] : memref<4x128xf32, #tpu.memory_space<vmem>>, vector<4x128xf32>
    %15 = arith.truncf %14 : vector<4x128xf32> to vector<4x128xbf16>
    %cst_6 = arith.constant dense<0.000000e+00> : vector<64x128xf32>
    %16 = tpu.matmul %13, %15, %cst_6 {dimension_numbers = #tpu.dot_dimension_numbers<[1], [0], [0], [1], [0, 0, 1, 1], [], []>} : vector<64x4xbf16>, vector<4x128xbf16>, vector<64x128xf32> -> vector<64x128xf32>
    %c0_7 = arith.constant 0 : index
    %c0_8 = arith.constant 0 : index
    %17 = vector.load %arg3[%c0_7, %c0_8] : memref<1x128xf32, #tpu.memory_space<vmem>>, vector<1x128xf32>
    %18 = vector.broadcast %17 : vector<1x128xf32> to vector<64x128xf32>
    %19 = arith.addf %16, %18 : vector<64x128xf32>
    %20 = vector.broadcast %8 : vector<1x128xf32> to vector<64x128xf32>
    %21 = arith.mulf %19, %20 : vector<64x128xf32>
    %c0_9 = arith.constant 0 : index
    %c0_10 = arith.constant 0 : index
    %22 = vector.load %arg2[%c0_9, %c0_10] : memref<32x128xf32, #tpu.memory_space<vmem>>, vector<32x128xf32>
    %23 = vector.broadcast %8 : vector<1x128xf32> to vector<32x128xf32>
    %24 = arith.mulf %22, %23 : vector<32x128xf32>
    %25 = arith.truncf %24 : vector<32x128xf32> to vector<32x128xbf16>
    %cst_11 = arith.constant 0.000000e+00 : f32
    %26 = vector.broadcast %cst_11 : f32 to vector<8x32xf32>
    %cst_12 = arith.constant 0.000000e+00 : f32
    %27 = vector.broadcast %cst_12 : f32 to vector<8x32xf32>
    %28 = arith.truncf %26 : vector<8x32xf32> to vector<8x32xbf16>
    %cst_13 = arith.constant dense<0.000000e+00> : vector<8x128xf32>
    %29 = tpu.matmul %28, %25, %cst_13 {dimension_numbers = #tpu.dot_dimension_numbers<[1], [0], [0], [1], [0, 0, 1, 1], [], []>} : vector<8x32xbf16>, vector<32x128xbf16>, vector<8x128xf32> -> vector<8x128xf32>
    %30 = vector.extract_strided_slice %21 {offsets = [0, 0], sizes = [8, 128], strides = [1, 1]} : vector<64x128xf32> to vector<8x128xf32>
    %31 = arith.addf %29, %30 : vector<8x128xf32>
    %32 = math.tanh %31 : vector<8x128xf32>
    %33 = vector.broadcast %8 : vector<1x128xf32> to vector<8x128xf32>
    %34 = arith.mulf %32, %33 : vector<8x128xf32>
    %35 = vector.broadcast %11 : vector<1x128xf32> to vector<8x128xf32>
    %36 = arith.addf %34, %35 : vector<8x128xf32>
    %37 = vector.extract_strided_slice %36 {offsets = [0, 0], sizes = [8, 32], strides = [1, 1]} : vector<8x128xf32> to vector<8x32xf32>
    %38 = vector.extract_strided_slice %36 {offsets = [0, 32], sizes = [8, 32], strides = [1, 1]} : vector<8x128xf32> to vector<8x32xf32>
    %39 = vector.extract_strided_slice %36 {offsets = [0, 64], sizes = [8, 32], strides = [1, 1]} : vector<8x128xf32> to vector<8x32xf32>
    %40 = vector.extract_strided_slice %36 {offsets = [0, 96], sizes = [8, 32], strides = [1, 1]} : vector<8x128xf32> to vector<8x32xf32>
    %41 = arith.mulf %38, %27 : vector<8x32xf32>
    %42 = arith.mulf %37, %39 : vector<8x32xf32>
    %43 = arith.addf %41, %42 : vector<8x32xf32>
    %44 = math.tanh %43 : vector<8x32xf32>
    %45 = arith.mulf %40, %44 : vector<8x32xf32>
    %46 = arith.truncf %45 : vector<8x32xf32> to vector<8x32xbf16>
    %cst_14 = arith.constant dense<0.000000e+00> : vector<8x128xf32>
    %47 = tpu.matmul %46, %25, %cst_14 {dimension_numbers = #tpu.dot_dimension_numbers<[1], [0], [0], [1], [0, 0, 1, 1], [], []>} : vector<8x32xbf16>, vector<32x128xbf16>, vector<8x128xf32> -> vector<8x128xf32>
    %48 = vector.extract_strided_slice %21 {offsets = [8, 0], sizes = [8, 128], strides = [1, 1]} : vector<64x128xf32> to vector<8x128xf32>
    %49 = arith.addf %47, %48 : vector<8x128xf32>
    %50 = math.tanh %49 : vector<8x128xf32>
    %51 = vector.broadcast %8 : vector<1x128xf32> to vector<8x128xf32>
    %52 = arith.mulf %50, %51 : vector<8x128xf32>
    %53 = vector.broadcast %11 : vector<1x128xf32> to vector<8x128xf32>
    %54 = arith.addf %52, %53 : vector<8x128xf32>
    %55 = vector.extract_strided_slice %54 {offsets = [0, 0], sizes = [8, 32], strides = [1, 1]} : vector<8x128xf32> to vector<8x32xf32>
    %56 = vector.extract_strided_slice %54 {offsets = [0, 32], sizes = [8, 32], strides = [1, 1]} : vector<8x128xf32> to vector<8x32xf32>
    %57 = vector.extract_strided_slice %54 {offsets = [0, 64], sizes = [8, 32], strides = [1, 1]} : vector<8x128xf32> to vector<8x32xf32>
    %58 = vector.extract_strided_slice %54 {offsets = [0, 96], sizes = [8, 32], strides = [1, 1]} : vector<8x128xf32> to vector<8x32xf32>
    %59 = arith.mulf %56, %43 : vector<8x32xf32>
    %60 = arith.mulf %55, %57 : vector<8x32xf32>
    %61 = arith.addf %59, %60 : vector<8x32xf32>
    %62 = math.tanh %61 : vector<8x32xf32>
    %63 = arith.mulf %58, %62 : vector<8x32xf32>
    %64 = arith.truncf %63 : vector<8x32xf32> to vector<8x32xbf16>
    %cst_15 = arith.constant dense<0.000000e+00> : vector<8x128xf32>
    %65 = tpu.matmul %64, %25, %cst_15 {dimension_numbers = #tpu.dot_dimension_numbers<[1], [0], [0], [1], [0, 0, 1, 1], [], []>} : vector<8x32xbf16>, vector<32x128xbf16>, vector<8x128xf32> -> vector<8x128xf32>
    %66 = vector.extract_strided_slice %21 {offsets = [16, 0], sizes = [8, 128], strides = [1, 1]} : vector<64x128xf32> to vector<8x128xf32>
    %67 = arith.addf %65, %66 : vector<8x128xf32>
    %68 = math.tanh %67 : vector<8x128xf32>
    %69 = vector.broadcast %8 : vector<1x128xf32> to vector<8x128xf32>
    %70 = arith.mulf %68, %69 : vector<8x128xf32>
    %71 = vector.broadcast %11 : vector<1x128xf32> to vector<8x128xf32>
    %72 = arith.addf %70, %71 : vector<8x128xf32>
    %73 = vector.extract_strided_slice %72 {offsets = [0, 0], sizes = [8, 32], strides = [1, 1]} : vector<8x128xf32> to vector<8x32xf32>
    %74 = vector.extract_strided_slice %72 {offsets = [0, 32], sizes = [8, 32], strides = [1, 1]} : vector<8x128xf32> to vector<8x32xf32>
    %75 = vector.extract_strided_slice %72 {offsets = [0, 64], sizes = [8, 32], strides = [1, 1]} : vector<8x128xf32> to vector<8x32xf32>
    %76 = vector.extract_strided_slice %72 {offsets = [0, 96], sizes = [8, 32], strides = [1, 1]} : vector<8x128xf32> to vector<8x32xf32>
    %77 = arith.mulf %74, %61 : vector<8x32xf32>
    %78 = arith.mulf %73, %75 : vector<8x32xf32>
    %79 = arith.addf %77, %78 : vector<8x32xf32>
    %80 = math.tanh %79 : vector<8x32xf32>
    %81 = arith.mulf %76, %80 : vector<8x32xf32>
    %82 = arith.truncf %81 : vector<8x32xf32> to vector<8x32xbf16>
    %cst_16 = arith.constant dense<0.000000e+00> : vector<8x128xf32>
    %83 = tpu.matmul %82, %25, %cst_16 {dimension_numbers = #tpu.dot_dimension_numbers<[1], [0], [0], [1], [0, 0, 1, 1], [], []>} : vector<8x32xbf16>, vector<32x128xbf16>, vector<8x128xf32> -> vector<8x128xf32>
    %84 = vector.extract_strided_slice %21 {offsets = [24, 0], sizes = [8, 128], strides = [1, 1]} : vector<64x128xf32> to vector<8x128xf32>
    %85 = arith.addf %83, %84 : vector<8x128xf32>
    %86 = math.tanh %85 : vector<8x128xf32>
    %87 = vector.broadcast %8 : vector<1x128xf32> to vector<8x128xf32>
    %88 = arith.mulf %86, %87 : vector<8x128xf32>
    %89 = vector.broadcast %11 : vector<1x128xf32> to vector<8x128xf32>
    %90 = arith.addf %88, %89 : vector<8x128xf32>
    %91 = vector.extract_strided_slice %90 {offsets = [0, 0], sizes = [8, 32], strides = [1, 1]} : vector<8x128xf32> to vector<8x32xf32>
    %92 = vector.extract_strided_slice %90 {offsets = [0, 32], sizes = [8, 32], strides = [1, 1]} : vector<8x128xf32> to vector<8x32xf32>
    %93 = vector.extract_strided_slice %90 {offsets = [0, 64], sizes = [8, 32], strides = [1, 1]} : vector<8x128xf32> to vector<8x32xf32>
    %94 = vector.extract_strided_slice %90 {offsets = [0, 96], sizes = [8, 32], strides = [1, 1]} : vector<8x128xf32> to vector<8x32xf32>
    %95 = arith.mulf %92, %79 : vector<8x32xf32>
    %96 = arith.mulf %91, %93 : vector<8x32xf32>
    %97 = arith.addf %95, %96 : vector<8x32xf32>
    %98 = math.tanh %97 : vector<8x32xf32>
    %99 = arith.mulf %94, %98 : vector<8x32xf32>
    %100 = arith.truncf %99 : vector<8x32xf32> to vector<8x32xbf16>
    %cst_17 = arith.constant dense<0.000000e+00> : vector<8x128xf32>
    %101 = tpu.matmul %100, %25, %cst_17 {dimension_numbers = #tpu.dot_dimension_numbers<[1], [0], [0], [1], [0, 0, 1, 1], [], []>} : vector<8x32xbf16>, vector<32x128xbf16>, vector<8x128xf32> -> vector<8x128xf32>
    %102 = vector.extract_strided_slice %21 {offsets = [32, 0], sizes = [8, 128], strides = [1, 1]} : vector<64x128xf32> to vector<8x128xf32>
    %103 = arith.addf %101, %102 : vector<8x128xf32>
    %104 = math.tanh %103 : vector<8x128xf32>
    %105 = vector.broadcast %8 : vector<1x128xf32> to vector<8x128xf32>
    %106 = arith.mulf %104, %105 : vector<8x128xf32>
    %107 = vector.broadcast %11 : vector<1x128xf32> to vector<8x128xf32>
    %108 = arith.addf %106, %107 : vector<8x128xf32>
    %109 = vector.extract_strided_slice %108 {offsets = [0, 0], sizes = [8, 32], strides = [1, 1]} : vector<8x128xf32> to vector<8x32xf32>
    %110 = vector.extract_strided_slice %108 {offsets = [0, 32], sizes = [8, 32], strides = [1, 1]} : vector<8x128xf32> to vector<8x32xf32>
    %111 = vector.extract_strided_slice %108 {offsets = [0, 64], sizes = [8, 32], strides = [1, 1]} : vector<8x128xf32> to vector<8x32xf32>
    %112 = vector.extract_strided_slice %108 {offsets = [0, 96], sizes = [8, 32], strides = [1, 1]} : vector<8x128xf32> to vector<8x32xf32>
    %113 = arith.mulf %110, %97 : vector<8x32xf32>
    %114 = arith.mulf %109, %111 : vector<8x32xf32>
    %115 = arith.addf %113, %114 : vector<8x32xf32>
    %116 = math.tanh %115 : vector<8x32xf32>
    %117 = arith.mulf %112, %116 : vector<8x32xf32>
    %118 = arith.truncf %117 : vector<8x32xf32> to vector<8x32xbf16>
    %cst_18 = arith.constant dense<0.000000e+00> : vector<8x128xf32>
    %119 = tpu.matmul %118, %25, %cst_18 {dimension_numbers = #tpu.dot_dimension_numbers<[1], [0], [0], [1], [0, 0, 1, 1], [], []>} : vector<8x32xbf16>, vector<32x128xbf16>, vector<8x128xf32> -> vector<8x128xf32>
    %120 = vector.extract_strided_slice %21 {offsets = [40, 0], sizes = [8, 128], strides = [1, 1]} : vector<64x128xf32> to vector<8x128xf32>
    %121 = arith.addf %119, %120 : vector<8x128xf32>
    %122 = math.tanh %121 : vector<8x128xf32>
    %123 = vector.broadcast %8 : vector<1x128xf32> to vector<8x128xf32>
    %124 = arith.mulf %122, %123 : vector<8x128xf32>
    %125 = vector.broadcast %11 : vector<1x128xf32> to vector<8x128xf32>
    %126 = arith.addf %124, %125 : vector<8x128xf32>
    %127 = vector.extract_strided_slice %126 {offsets = [0, 0], sizes = [8, 32], strides = [1, 1]} : vector<8x128xf32> to vector<8x32xf32>
    %128 = vector.extract_strided_slice %126 {offsets = [0, 32], sizes = [8, 32], strides = [1, 1]} : vector<8x128xf32> to vector<8x32xf32>
    %129 = vector.extract_strided_slice %126 {offsets = [0, 64], sizes = [8, 32], strides = [1, 1]} : vector<8x128xf32> to vector<8x32xf32>
    %130 = vector.extract_strided_slice %126 {offsets = [0, 96], sizes = [8, 32], strides = [1, 1]} : vector<8x128xf32> to vector<8x32xf32>
    %131 = arith.mulf %128, %115 : vector<8x32xf32>
    %132 = arith.mulf %127, %129 : vector<8x32xf32>
    %133 = arith.addf %131, %132 : vector<8x32xf32>
    %134 = math.tanh %133 : vector<8x32xf32>
    %135 = arith.mulf %130, %134 : vector<8x32xf32>
    %136 = arith.truncf %135 : vector<8x32xf32> to vector<8x32xbf16>
    %cst_19 = arith.constant dense<0.000000e+00> : vector<8x128xf32>
    %137 = tpu.matmul %136, %25, %cst_19 {dimension_numbers = #tpu.dot_dimension_numbers<[1], [0], [0], [1], [0, 0, 1, 1], [], []>} : vector<8x32xbf16>, vector<32x128xbf16>, vector<8x128xf32> -> vector<8x128xf32>
    %138 = vector.extract_strided_slice %21 {offsets = [48, 0], sizes = [8, 128], strides = [1, 1]} : vector<64x128xf32> to vector<8x128xf32>
    %139 = arith.addf %137, %138 : vector<8x128xf32>
    %140 = math.tanh %139 : vector<8x128xf32>
    %141 = vector.broadcast %8 : vector<1x128xf32> to vector<8x128xf32>
    %142 = arith.mulf %140, %141 : vector<8x128xf32>
    %143 = vector.broadcast %11 : vector<1x128xf32> to vector<8x128xf32>
    %144 = arith.addf %142, %143 : vector<8x128xf32>
    %145 = vector.extract_strided_slice %144 {offsets = [0, 0], sizes = [8, 32], strides = [1, 1]} : vector<8x128xf32> to vector<8x32xf32>
    %146 = vector.extract_strided_slice %144 {offsets = [0, 32], sizes = [8, 32], strides = [1, 1]} : vector<8x128xf32> to vector<8x32xf32>
    %147 = vector.extract_strided_slice %144 {offsets = [0, 64], sizes = [8, 32], strides = [1, 1]} : vector<8x128xf32> to vector<8x32xf32>
    %148 = vector.extract_strided_slice %144 {offsets = [0, 96], sizes = [8, 32], strides = [1, 1]} : vector<8x128xf32> to vector<8x32xf32>
    %149 = arith.mulf %146, %133 : vector<8x32xf32>
    %150 = arith.mulf %145, %147 : vector<8x32xf32>
    %151 = arith.addf %149, %150 : vector<8x32xf32>
    %152 = math.tanh %151 : vector<8x32xf32>
    %153 = arith.mulf %148, %152 : vector<8x32xf32>
    %154 = arith.truncf %153 : vector<8x32xf32> to vector<8x32xbf16>
    %cst_20 = arith.constant dense<0.000000e+00> : vector<8x128xf32>
    %155 = tpu.matmul %154, %25, %cst_20 {dimension_numbers = #tpu.dot_dimension_numbers<[1], [0], [0], [1], [0, 0, 1, 1], [], []>} : vector<8x32xbf16>, vector<32x128xbf16>, vector<8x128xf32> -> vector<8x128xf32>
    %156 = vector.extract_strided_slice %21 {offsets = [56, 0], sizes = [8, 128], strides = [1, 1]} : vector<64x128xf32> to vector<8x128xf32>
    %157 = arith.addf %155, %156 : vector<8x128xf32>
    %158 = math.tanh %157 : vector<8x128xf32>
    %159 = vector.broadcast %8 : vector<1x128xf32> to vector<8x128xf32>
    %160 = arith.mulf %158, %159 : vector<8x128xf32>
    %161 = vector.broadcast %11 : vector<1x128xf32> to vector<8x128xf32>
    %162 = arith.addf %160, %161 : vector<8x128xf32>
    %163 = vector.extract_strided_slice %162 {offsets = [0, 0], sizes = [8, 32], strides = [1, 1]} : vector<8x128xf32> to vector<8x32xf32>
    %164 = vector.extract_strided_slice %162 {offsets = [0, 32], sizes = [8, 32], strides = [1, 1]} : vector<8x128xf32> to vector<8x32xf32>
    %165 = vector.extract_strided_slice %162 {offsets = [0, 64], sizes = [8, 32], strides = [1, 1]} : vector<8x128xf32> to vector<8x32xf32>
    %166 = vector.extract_strided_slice %162 {offsets = [0, 96], sizes = [8, 32], strides = [1, 1]} : vector<8x128xf32> to vector<8x32xf32>
    %167 = arith.mulf %164, %151 : vector<8x32xf32>
    %168 = arith.mulf %163, %165 : vector<8x32xf32>
    %169 = arith.addf %167, %168 : vector<8x32xf32>
    %170 = math.tanh %169 : vector<8x32xf32>
    %171 = arith.mulf %166, %170 : vector<8x32xf32>
    %c0_21 = arith.constant 0 : index
    %c0_22 = arith.constant 0 : index
    %172 = vector.load %arg4[%c0_21, %c0_22] : memref<32x3xf32, #tpu.memory_space<vmem>>, vector<32x3xf32>
    %cst_23 = arith.constant dense<0.000000e+00> : vector<8x3xf32>
    %173 = tpu.matmul %171, %172, %cst_23 {dimension_numbers = #tpu.dot_dimension_numbers<[1], [0], [0], [1], [0, 0, 1, 1], [], []>} : vector<8x32xf32>, vector<32x3xf32>, vector<8x3xf32> -> vector<8x3xf32>
    %c0_24 = arith.constant 0 : index
    %c0_25 = arith.constant 0 : index
    %174 = vector.load %arg5[%c0_24, %c0_25] : memref<1x3xf32, #tpu.memory_space<vmem>>, vector<1x3xf32>
    %175 = vector.broadcast %174 : vector<1x3xf32> to vector<8x3xf32>
    %176 = arith.addf %173, %175 : vector<8x3xf32>
    %177 = vector.extract_strided_slice %176 {offsets = [0, 0], sizes = [2, 3], strides = [1, 1]} : vector<8x3xf32> to vector<2x3xf32>
    %c0_26 = arith.constant 0 : index
    %c0_27 = arith.constant 0 : index
    %178 = vector.load %arg6[%c0_26, %c0_27] : memref<2x3xf32, #tpu.memory_space<vmem>>, vector<2x3xf32>
    tpu.vector_store %arg6[%c0_26, %c0_27], %177 {strides = array<i32>} : memref<2x3xf32, #tpu.memory_space<vmem>>, vector<2x3xf32>,
    return
  }
}

</mosaic_0001>

<bundles_post_ra>
// kernel: predictor_forward.1
= control target key start
LH: loop header
LB: loop body
LE: loop exit
PB: predicated region body
PF: predicated region fallthrough
CT: control target
= control target key end

     0   :  { %vm63_vm0 = vcmask 1041408   ;;  %v25_v3 = vlaneseq  ;;  %s753_s0 = inlined_call_operand.vmem [shape: f32[64,4], index: 0, kind: input, shape index: {}]   ;;  %s754_s1 = inlined_call_operand.vmem [shape: f32[4,128], index: 1, kind: input, shape index: {}]   ;;  %s755_s2 = inlined_call_operand.vmem [shape: f32[32,128], index: 2, kind: input, shape index: {}]   ;;  %s756_s3 = inlined_call_operand.vmem [shape: f32[1,128], index: 3, kind: input, shape index: {}]   ;;  %s757_s4 = inlined_call_operand.vmem [shape: f32[32,3], index: 4, kind: input, shape index: {}]   ;;  %s758_s5 = inlined_call_operand.vmem [shape: f32[1,3], index: 5, kind: input, shape index: {}]   ;;  %s759_s6 = inlined_call_operand.hbm [shape: f32[2,3], index: 6, kind: output, shape index: {}]  }
   0x1   :  { %v44_v0 = vld [vmem:[%s754_s1] sm:$0xf]  ;;  %v33_v2 = vld [vmem:[%s753_s0 + $0x8] sm:$0xff]  ;;  %v106_v8 = vld [vmem:[%s755_s2 + $0x10] sm:$0xff] }
   0x2   :  { %v32_v1 = vld [vmem:[%s753_s0] sm:$0xff]  ;;  %v45_v4 = vpack.c.bf16 %v44_v0, %v44_v0  ;;  %v26_v5 = vand.u32 127, %v25_v3 }
   0x3   :  { %v40_v7 = vpack.c.bf16 %v33_v2, %v32_v1 }
   0x4   :  { %v65_v6 = vsel %vm63_vm0, %v45_v4, 0 }
   0x5   :  { %11 = vsyncpa [#allocation3], 0  ;;  %74 = vmatpush.bf16.msra.mxu0 %v65_v6  ;;  %vm50_vm1 = vcmask 31744   ;;  %vm27_vm2 = vcmp.ge.s32.totalorder %v26_v5, 64  ;;  %vm28_vm3 = vcmp.lt.s32.totalorder %v26_v5, 96  ;;  %v107_v9 = vld [vmem:[%s755_s2 + $0x18] sm:$0xff] }
   0x6   :  { %v104_v10 = vld [vmem:[%s755_s2] sm:$0xff]  ;;  %v105_v11 = vld [vmem:[%s755_s2 + $0x8] sm:$0xff]  ;;  %vm620_vm4 = vmand %vm27_vm2, %vm28_vm3  ;;  %v559_v13 = vmov 0.5   ;;  %v560_v21 = vmov 0   ;;  %s562_s11 = smov 32   ;;  %vm114_vm5 = vcmask 261120  }
   0x7   :  { %v626_v14 = vsel %vm620_vm4, 1.0, %v559_v13  ;;  %v636_v22 = vld [vmem:[%s756_s3] ss:$0 sm:$0xff]  ;;  %v642_v30 = vsel %vm620_vm4, 0.0, %v559_v13  ;;  %s561_s3 = smov 64   ;;  %v34_v58 = vld [vmem:[%s753_s0 + $0x10] sm:$0xff] }
   0x8   :  { %482 = vmatmul.msk.bf16.vlgmr.msra.gmra.mxu0 %vm50_vm1, %v40_v7  ;;  %v110_v15 = vmul.f32 %v106_v8, %v626_v14  ;;  %v111_v16 = vmul.f32 %v107_v9, %v626_v14  ;;  %v108_v17 = vmul.f32 %v104_v10, %v626_v14  ;;  %v109_v18 = vmul.f32 %v105_v11, %v626_v14  ;;  %v35_v59 = vld [vmem:[%s753_s0 + $0x18] sm:$0xff]  ;;  %s563_s8 = smov [#allocation2]  }
   0x9   :  { %v41_v60 = vpack.c.bf16 %v35_v59, %v34_v58  ;;  %s471_s9 = sshll.u32 %s563_s8, 4  ;;  %vm464_vm6 = vcmask 17408   ;;  %s472_s9 = int_to_ptr.vmem [resolvable:$true] %s471_s9 }
   0xa   :  { %v113_v19 = vpack.c.bf16 %v111_v16, %v110_v15  ;;  %v112_v20 = vpack.c.bf16 %v109_v18, %v108_v17 }
   0xc   :  { %124 = vmatpush.bf16.msra.mxu1 %v113_v19  ;;  %164 = vmatpush.bf16.msra.mxu2 %v113_v19 }
   0xd   :  { %204 = vmatpush.bf16.msra.mxu3 %v113_v19 }
  0x10   :  { %125 = vmatpush.bf16.msra.mxu1 %v112_v20  ;;  %165 = vmatpush.bf16.msra.mxu2 %v112_v20 }
  0x11   :  { %205 = vmatpush.bf16.msra.mxu3 %v112_v20 }
  0x13   :  { %126 = vmatmul.bf16.vlgmr.msra.gmra.mxu1 %v560_v21 }
  0x14   :  { %244 = vmatpush.bf16.msrb.mxu1 %v113_v19  ;;  %284 = vmatpush.bf16.msrb.mxu2 %v113_v19 }
  0x15   :  { %324 = vmatpush.bf16.msrb.mxu3 %v113_v19 }
  0x18   :  { %245 = vmatpush.bf16.msrb.mxu1 %v112_v20  ;;  %285 = vmatpush.bf16.msrb.mxu2 %v112_v20 }
  0x19   :  { %325 = vmatpush.bf16.msrb.mxu3 %v112_v20  ;;  %483 = vmatmul.msk.bf16.gmra.mxu0 %vm50_vm1, %v41_v60 }
  0x1c   :  { %364 = vmatpush.bf16.msra.mxu1 %v113_v19 }
  0x20   :  { %365 = vmatpush.bf16.msra.mxu1 %v112_v20 }
  0x85   :  { %v76_v23 = vpop.f32.mrf.mxu0 }
  0x86   :  { %v77_v24 = vadd.f32 %v636_v22, %v76_v23 }
  0x88   :  { %v96_v25 = vmul.f32 %v77_v24, %v626_v14 }
  0x8d   :  { %v78_v43 = vpop.f32.mrf.mxu0 }
  0x8e   :  { %v79_v44 = vadd.f32 %v636_v22, %v78_v43 }
  0x90   :  { %v127_v26 = vpop.f32.mrf.mxu1  ;;  %v97_v45 = vmul.f32 %v79_v44, %v626_v14 }
  0x91   :  { %v128_v27 = vadd.f32 %v127_v26, %v96_v25 }
  0x93   :  { %501 = vtanh.f32 %v128_v27 }
  0x96   :  { %v81_v1 = vpop.f32.mrf.mxu0 }
  0x97   :  { %v82_v2 = vadd.f32 %v636_v22, %v81_v1 }
  0x98   :  { %v129_v28 = vpop.f32.mrf.mxu1 }
  0x99   :  { %v502_v29 = vpop.eup %501  ;;  %v98_v3 = vmul.f32 %v82_v2, %v626_v14 }
  0x9a   :  { %v132_v31 = vmul.f32 %v502_v29, %v626_v14 }
  0x9c   :  { %v133_v32 = vadd.f32 %v132_v31, %v642_v30 }
  0x9e   :  { %136 = vrot.lane.b32.xlu0 %v133_v32, %s561_s3  ;;  %v134_v35 = vmul.f32 0.0, %v133_v32  ;;  %v83_v21 = vpop.f32.mrf.mxu0 }
  0x9f   :  { %v84_v23 = vadd.f32 %v636_v22, %v83_v21 }
  0xa1   :  { %v99_v24 = vmul.f32 %v84_v23, %v626_v14 }
 0x110   :  { %v137_v33 = vpop.permute.xlu0 %136 }
 0x111   :  { %v139_v34 = vmul.f32 %v137_v33, %v133_v32 }
 0x113   :  { %141 = vrot.lane.b32.xlu0 %v139_v34, %s562_s11 }
 0x185   :  { %v142_v36 = vpop.permute.xlu0 %141 }
 0x186   :  { %v144_v37 = vadd.f32 %v142_v36, %v134_v35 }
 0x188   :  { %503 = vtanh.f32 %v144_v37 }
 0x18e   :  { %v504_v38 = vpop.eup %503 }
 0x18f   :  { %147 = vrot.lane.b32.xlu1 %v504_v38, %s561_s3  ;;  %v36_v38 = vld [vmem:[%s753_s0 + $0x20] sm:$0xff] }
 0x201   :  { %v148_v39 = vpop.permute.xlu1 %147 }
 0x202   :  { %v150_v40 = vmul.f32 %v148_v39, %v133_v32  ;;  %v37_v39 = vld [vmem:[%s753_s0 + $0x28] sm:$0xff] }
 0x204   :  { %v151_v41 = vpack.c.bf16 %v150_v40, %v150_v40  ;;  %v42_v40 = vpack.c.bf16 %v37_v39, %v36_v38 }
 0x206   :  { %153 = vrot.lane.b32.xlu1 %v151_v41, %s562_s11  ;;  %484 = vmatmul.msk.bf16.gmra.mxu0 %vm50_vm1, %v42_v40 }
 0x278   :  { %v154_v42 = vpop.permute.xlu1 %153 }
 0x279   :  { %486 = vmatmul.msk.bf16.vlgmr.msra.gmra.mxu2 %vm114_vm5, %v154_v42 }
 0x27a   :  { %404 = vmatpush.bf16.msra.mxu2 %v113_v19 }
 0x27e   :  { %405 = vmatpush.bf16.msra.mxu2 %v112_v20 }
 0x2fc   :  { %v167_v46 = vpop.f32.mrf.mxu2 }
 0x2fd   :  { %v168_v47 = vadd.f32 %v167_v46, %v97_v45  ;;  %v86_v45 = vpop.f32.mrf.mxu0 }
 0x2fe   :  { %v87_v46 = vadd.f32 %v636_v22, %v86_v45 }
 0x2ff   :  { %505 = vtanh.f32 %v168_v47 }
 0x300   :  { %v100_v47 = vmul.f32 %v87_v46, %v626_v14 }
 0x304   :  { %v169_v48 = vpop.f32.mrf.mxu2 }
 0x305   :  { %v506_v49 = vpop.eup %505 }
 0x306   :  { %v172_v50 = vmul.f32 %v506_v49, %v626_v14 }
 0x308   :  { %v173_v51 = vadd.f32 %v172_v50, %v642_v30 }
 0x30a   :  { %176 = vrot.lane.b32.xlu2 %v173_v51, %s561_s3  ;;  %v174_v54 = vmul.f32 %v173_v51, %v144_v37 }
 0x364   :  { %v177_v52 = vpop.permute.xlu2 %176 }
 0x365   :  { %v179_v53 = vmul.f32 %v177_v52, %v173_v51 }
 0x367   :  { %181 = vrot.lane.b32.xlu2 %v179_v53, %s562_s11 }
 0x3c1   :  { %v182_v55 = vpop.permute.xlu2 %181 }
 0x3c2   :  { %v184_v56 = vadd.f32 %v182_v55, %v174_v54 }
 0x3c4   :  { %507 = vtanh.f32 %v184_v56 }
 0x3ca   :  { %v508_v57 = vpop.eup %507 }
 0x3cb   :  { %187 = vrot.lane.b32.xlu0 %v508_v57, %s561_s3 }
 0x43d   :  { %v188_v61 = vpop.permute.xlu0 %187 }
 0x43e   :  { %v190_v62 = vmul.f32 %v188_v61, %v173_v51 }
 0x440   :  { %v191_v63 = vpack.c.bf16 %v190_v62, %v190_v62 }
 0x442   :  { %193 = vrot.lane.b32.xlu1 %v191_v63, %s562_s11 }
 0x4b4   :  { %v194_v0 = vpop.permute.xlu1 %193 }
 0x4b5   :  { %487 = vmatmul.msk.bf16.vlgmr.msra.gmra.mxu3 %vm114_vm5, %v194_v0  ;;  %v88_v0 = vpop.f32.mrf.mxu0 }
 0x4b6   :  { %v89_v1 = vadd.f32 %v636_v22, %v88_v0 }
 0x4b8   :  { %v101_v2 = vmul.f32 %v89_v1, %v626_v14 }
 0x538   :  { %v207_v4 = vpop.f32.mrf.mxu3 }
 0x539   :  { %v208_v5 = vadd.f32 %v207_v4, %v98_v3 }
 0x53b   :  { %509 = vtanh.f32 %v208_v5 }
 0x540   :  { %v209_v6 = vpop.f32.mrf.mxu3 }
 0x541   :  { %v510_v7 = vpop.eup %509 }
 0x542   :  { %v212_v8 = vmul.f32 %v510_v7, %v626_v14 }
 0x544   :  { %v213_v9 = vadd.f32 %v212_v8, %v642_v30 }
 0x546   :  { %216 = vrot.lane.b32.xlu2 %v213_v9, %s561_s3  ;;  %v214_v12 = vmul.f32 %v213_v9, %v184_v56 }
 0x5a0   :  { %v217_v10 = vpop.permute.xlu2 %216 }
 0x5a1   :  { %v219_v11 = vmul.f32 %v217_v10, %v213_v9 }
 0x5a3   :  { %221 = vrot.lane.b32.xlu0 %v219_v11, %s562_s11 }
 0x615   :  { %v222_v13 = vpop.permute.xlu0 %221 }
 0x616   :  { %v224_v15 = vadd.f32 %v222_v13, %v214_v12 }
 0x618   :  { %511 = vtanh.f32 %v224_v15 }
 0x61e   :  { %v512_v16 = vpop.eup %511 }
 0x61f   :  { %227 = vrot.lane.b32.xlu1 %v512_v16, %s561_s3  ;;  %v38_v16 = vld [vmem:[%s753_s0 + $0x30] sm:$0xff] }
 0x691   :  { %v228_v17 = vpop.permute.xlu1 %227 }
 0x692   :  { %v230_v18 = vmul.f32 %v228_v17, %v213_v9  ;;  %v39_v17 = vld [vmem:[%s753_s0 + $0x38] sm:$0xff] }
 0x694   :  { %v231_v19 = vpack.c.bf16 %v230_v18, %v230_v18  ;;  %v43_v18 = vpack.c.bf16 %v39_v17, %v38_v16 }
 0x696   :  { %233 = vrot.lane.b32.xlu2 %v231_v19, %s562_s11  ;;  %485 = vmatmul.msk.bf16.gmra.mxu0 %vm50_vm1, %v43_v18 }
 0x6f0   :  { %v234_v20 = vpop.permute.xlu2 %233 }
 0x6f1   :  { %488 = vmatmul.msk.bf16.vlgmr.msrb.gmra.mxu1 %vm114_vm5, %v234_v20 }
 0x76e   :  { %v247_v25 = vpop.f32.mrf.mxu1 }
 0x76f   :  { %v248_v26 = vadd.f32 %v247_v25, %v99_v24  ;;  %v91_v24 = vpop.f32.mrf.mxu0 }
 0x770   :  { %v92_v25 = vadd.f32 %v636_v22, %v91_v24 }
 0x771   :  { %513 = vtanh.f32 %v248_v26 }
 0x772   :  { %v102_v26 = vmul.f32 %v92_v25, %v626_v14 }
 0x776   :  { %v249_v27 = vpop.f32.mrf.mxu1 }
 0x777   :  { %v514_v28 = vpop.eup %513 }
 0x778   :  { %v252_v29 = vmul.f32 %v514_v28, %v626_v14 }
 0x77a   :  { %v253_v31 = vadd.f32 %v252_v29, %v642_v30 }
 0x77c   :  { %256 = vrot.lane.b32.xlu0 %v253_v31, %s561_s3  ;;  %v254_v34 = vmul.f32 %v253_v31, %v224_v15 }
 0x7ee   :  { %v257_v32 = vpop.permute.xlu0 %256 }
 0x7ef   :  { %v259_v33 = vmul.f32 %v257_v32, %v253_v31 }
 0x7f1   :  { %261 = vrot.lane.b32.xlu1 %v259_v33, %s562_s11 }
 0x863   :  { %v262_v35 = vpop.permute.xlu1 %261 }
 0x864   :  { %v264_v36 = vadd.f32 %v262_v35, %v254_v34 }
 0x866   :  { %515 = vtanh.f32 %v264_v36 }
 0x86c   :  { %v516_v37 = vpop.eup %515 }
 0x86d   :  { %267 = vrot.lane.b32.xlu2 %v516_v37, %s561_s3 }
 0x8c7   :  { %v268_v41 = vpop.permute.xlu2 %267 }
 0x8c8   :  { %v270_v42 = vmul.f32 %v268_v41, %v253_v31 }
 0x8ca   :  { %v271_v43 = vpack.c.bf16 %v270_v42, %v270_v42 }
 0x8cc   :  { %273 = vrot.lane.b32.xlu0 %v271_v43, %s562_s11 }
 0x93e   :  { %v274_v44 = vpop.permute.xlu0 %273 }
 0x93f   :  { %489 = vmatmul.msk.bf16.vlgmr.msrb.gmra.mxu2 %vm114_vm5, %v274_v44  ;;  %v93_v44 = vpop.f32.mrf.mxu0 }
 0x940   :  { %v94_v45 = vadd.f32 %v636_v22, %v93_v44 }
 0x942   :  { %v103_v46 = vmul.f32 %v94_v45, %v626_v14 }
 0x9c2   :  { %v287_v48 = vpop.f32.mrf.mxu2 }
 0x9c3   :  { %v288_v49 = vadd.f32 %v287_v48, %v100_v47 }
 0x9c5   :  { %517 = vtanh.f32 %v288_v49 }
 0x9ca   :  { %v289_v50 = vpop.f32.mrf.mxu2 }
 0x9cb   :  { %v518_v51 = vpop.eup %517 }
 0x9cc   :  { %v292_v52 = vmul.f32 %v518_v51, %v626_v14 }
 0x9ce   :  { %v293_v53 = vadd.f32 %v292_v52, %v642_v30 }
 0x9d0   :  { %296 = vrot.lane.b32.xlu1 %v293_v53, %s561_s3  ;;  %v294_v56 = vmul.f32 %v293_v53, %v264_v36 }
 0xa42   :  { %v297_v54 = vpop.permute.xlu1 %296 }
 0xa43   :  { %v299_v55 = vmul.f32 %v297_v54, %v293_v53 }
 0xa45   :  { %301 = vrot.lane.b32.xlu2 %v299_v55, %s562_s11 }
 0xa9f   :  { %v302_v57 = vpop.permute.xlu2 %301 }
 0xaa0   :  { %v304_v58 = vadd.f32 %v302_v57, %v294_v56 }
 0xaa2   :  { %519 = vtanh.f32 %v304_v58 }
 0xaa8   :  { %v520_v59 = vpop.eup %519 }
 0xaa9   :  { %307 = vrot.lane.b32.xlu0 %v520_v59, %s561_s3  ;;  %v431_v59 = vld [vmem:[%s757_s4] sm:$0xff] }
 0xb1b   :  { %v308_v60 = vpop.permute.xlu0 %307 }
 0xb1c   :  { %v310_v61 = vmul.f32 %v308_v60, %v293_v53 }
 0xb1e   :  { %v311_v62 = vpack.c.bf16 %v310_v61, %v310_v61 }
 0xb20   :  { %313 = vrot.lane.b32.xlu1 %v311_v62, %s562_s11 }
 0xb92   :  { %v314_v63 = vpop.permute.xlu1 %313 }
 0xb93   :  { %490 = vmatmul.msk.bf16.vlgmr.msrb.gmra.mxu3 %vm114_vm5, %v314_v63  ;;  %v500_v63 = vld [vmem:[%s758_s5] ss:$0 sm:$0xff] }
 0xc16   :  { %v327_v3 = vpop.f32.mrf.mxu3 }
 0xc17   :  { %v328_v4 = vadd.f32 %v327_v3, %v101_v2 }
 0xc19   :  { %521 = vtanh.f32 %v328_v4 }
 0xc1e   :  { %v329_v5 = vpop.f32.mrf.mxu3 }
 0xc1f   :  { %v522_v6 = vpop.eup %521 }
 0xc20   :  { %v332_v7 = vmul.f32 %v522_v6, %v626_v14 }
 0xc22   :  { %v333_v8 = vadd.f32 %v332_v7, %v642_v30 }
 0xc24   :  { %336 = vrot.lane.b32.xlu2 %v333_v8, %s561_s3  ;;  %v334_v11 = vmul.f32 %v333_v8, %v304_v58  ;;  %v434_v58 = vld [vmem:[%s757_s4 + $0x18] sm:$0xff] }
 0xc25   :  { %456 = vmatpush.msra.mxu3 %v434_v58 }
 0xc7e   :  { %v337_v9 = vpop.permute.xlu2 %336 }
 0xc7f   :  { %v339_v10 = vmul.f32 %v337_v9, %v333_v8 }
 0xc81   :  { %341 = vrot.lane.b32.xlu0 %v339_v10, %s562_s11 }
 0xcf3   :  { %v342_v12 = vpop.permute.xlu0 %341 }
 0xcf4   :  { %v344_v13 = vadd.f32 %v342_v12, %v334_v11 }
 0xcf6   :  { %523 = vtanh.f32 %v344_v13 }
 0xcfc   :  { %v524_v15 = vpop.eup %523 }
 0xcfd   :  { %347 = vrot.lane.b32.xlu1 %v524_v15, %s561_s3 }
 0xd6f   :  { %v348_v19 = vpop.permute.xlu1 %347 }
 0xd70   :  { %v350_v20 = vmul.f32 %v348_v19, %v333_v8 }
 0xd72   :  { %v351_v21 = vpack.c.bf16 %v350_v20, %v350_v20 }
 0xd74   :  { %353 = vrot.lane.b32.xlu2 %v351_v21, %s562_s11 }
 0xdce   :  { %v354_v23 = vpop.permute.xlu2 %353 }
 0xdcf   :  { %491 = vmatmul.msk.bf16.vlgmr.msra.gmra.mxu1 %vm114_vm5, %v354_v23 }
 0xe4c   :  { %v367_v27 = vpop.f32.mrf.mxu1 }
 0xe4d   :  { %v368_v28 = vadd.f32 %v367_v27, %v102_v26 }
 0xe4f   :  { %525 = vtanh.f32 %v368_v28 }
 0xe54   :  { %v369_v29 = vpop.f32.mrf.mxu1 }
 0xe55   :  { %v526_v31 = vpop.eup %525 }
 0xe56   :  { %v372_v32 = vmul.f32 %v526_v31, %v626_v14 }
 0xe58   :  { %v373_v33 = vadd.f32 %v372_v32, %v642_v30 }
 0xe5a   :  { %376 = vrot.lane.b32.xlu0 %v373_v33, %s561_s3  ;;  %v374_v36 = vmul.f32 %v373_v33, %v344_v13 }
 0xecc   :  { %v377_v34 = vpop.permute.xlu0 %376 }
 0xecd   :  { %v379_v35 = vmul.f32 %v377_v34, %v373_v33 }
 0xecf   :  { %381 = vrot.lane.b32.xlu1 %v379_v35, %s562_s11 }
 0xf41   :  { %v382_v37 = vpop.permute.xlu1 %381 }
 0xf42   :  { %v384_v38 = vadd.f32 %v382_v37, %v374_v36 }
 0xf44   :  { %527 = vtanh.f32 %v384_v38 }
 0xf4a   :  { %v528_v39 = vpop.eup %527 }
 0xf4b   :  { %387 = vrot.lane.b32.xlu2 %v528_v39, %s561_s3 }
 0xfa5   :  { %v388_v40 = vpop.permute.xlu2 %387 }
 0xfa6   :  { %v390_v41 = vmul.f32 %v388_v40, %v373_v33 }
 0xfa8   :  { %v391_v42 = vpack.c.bf16 %v390_v41, %v390_v41 }
 0xfaa   :  { %393 = vrot.lane.b32.xlu0 %v391_v42, %s562_s11 }
0x101c   :  { %v394_v43 = vpop.permute.xlu0 %393 }
0x101d   :  { %492 = vmatmul.msk.bf16.vlgmr.msra.gmra.mxu2 %vm114_vm5, %v394_v43 }
0x10a0   :  { %v407_v47 = vpop.f32.mrf.mxu2 }
0x10a1   :  { %v408_v48 = vadd.f32 %v407_v47, %v103_v46 }
0x10a3   :  { %529 = vtanh.f32 %v408_v48 }
0x10a8   :  { %v409_v49 = vpop.f32.mrf.mxu2 }
0x10a9   :  { %v530_v50 = vpop.eup %529 }
0x10aa   :  { %v412_v51 = vmul.f32 %v530_v50, %v626_v14  ;;  %v433_v14 = vld [vmem:[%s757_s4 + $0x10] sm:$0xff] }
0x10ab   :  { %457 = vmatpush.msra.mxu3 %v433_v14 }
0x10ac   :  { %v413_v52 = vadd.f32 %v412_v51, %v642_v30  ;;  %v432_v30 = vld [vmem:[%s757_s4 + $0x8] sm:$0xff] }
0x10ad   :  { %458 = vmatpush.msra.mxu3 %v432_v30 }
0x10ae   :  { %416 = vrot.lane.b32.xlu1 %v413_v52, %s561_s3  ;;  %v414_v55 = vmul.f32 %v413_v52, %v384_v38 }
0x10af   :  { %459 = vmatpush.msra.mxu3 %v431_v59 }
0x1120   :  { %v417_v53 = vpop.permute.xlu1 %416 }
0x1121   :  { %v419_v54 = vmul.f32 %v417_v53, %v413_v52 }
0x1123   :  { %421 = vrot.lane.b32.xlu2 %v419_v54, %s562_s11 }
0x117d   :  { %v422_v56 = vpop.permute.xlu2 %421 }
0x117e   :  { %v424_v22 = vadd.f32 %v422_v56, %v414_v55 }
0x1180   :  { %531 = vtanh.f32 %v424_v22 }
0x1186   :  { %v532_v57 = vpop.eup %531 }
0x1187   :  { %427 = vrot.lane.b32.xlu0 %v532_v57, %s561_s3  ;;  %s473_s3 = sshll.u32 %s759_s6, 4  ;;  %s474_s3 = int_to_ptr.hbm [resolvable:$true] %s473_s3 }
0x11f9   :  { %v428_v60 = vpop.permute.xlu0 %427 }
0x11fa   :  { %v430_v61 = vmul.f32 %v428_v60, %v413_v52 }
0x11fc   :  { %440 = vrot.lane.b32.xlu1 %v430_v61, %s562_s11 }
0x126e   :  { %v441_v62 = vpop.permute.xlu1 %440 }
0x126f   :  { %493 = vmatmul.msk.f32.vlgmr.msra.gmra.mxu3 %vm114_vm5, %v441_v62 }
0x12f2   :  { %v461_v0 = vpop.f32.mrf.mxu3 }
0x12f3   :  { %v462_v1 = vadd.f32 %v500_v63, %v461_v0 }
0x12f5   :  { %465 = vst.msk [vmem:[#allocation2] sm:$0x3] %vm464_vm6, %v462_v1 }
0x12f6   :  { %476 = dma.vmem_to_hbm [thread:$0]  %s472_s9, 32, %s474_s3, [#allocation3]  }
0x12f7   :  { %557 = dma.done.wait [#allocation3], 32  }
0x12f8   :  { %558 = vsyncadd [#allocation3], 4294967264 }
0x12f9   :  { %481 = vsyncpa [#allocation3], 1 }

</bundles_post_ra>
